<compile_context>
chip_gen: v5e
topology: v5e:2x2
jax: 0.10.0
libtpu: 0.0.40
codegen_flags: <defaults>
</compile_context>

<pallas_src>
import jax
import jax.numpy as jnp
from jax.experimental import pallas as pl
from jax.experimental.pallas import tpu as pltpu

LANE = 128  # TPU lane width; every feature dim is padded to this.


def dqn_kernel(x_ref, w_ref, b_ref, o_ref):
    """Fused 4-layer MLP. x_ref: (tm, 128) compute dtype; w_ref: (4, 128, 128) compute dtype;
    b_ref: (4, 128) f32; o_ref: (tm, 128) f32. Matmuls accumulate in f32 on the MXU."""
    cd = x_ref.dtype
    x = x_ref[...]

    h = jnp.dot(x, w_ref[0], preferred_element_type=jnp.float32) + b_ref[pl.ds(0, 1), :]
    h = jnp.maximum(h, 0.0).astype(cd)

    h = jnp.dot(h, w_ref[1], preferred_element_type=jnp.float32) + b_ref[pl.ds(1, 1), :]
    h = jnp.maximum(h, 0.0).astype(cd)

    h = jnp.dot(h, w_ref[2], preferred_element_type=jnp.float32) + b_ref[pl.ds(2, 1), :]
    h = jnp.maximum(h, 0.0).astype(cd)

    out = jnp.dot(h, w_ref[3], preferred_element_type=jnp.float32) + b_ref[pl.ds(3, 1), :]
    o_ref[...] = out.astype(o_ref.dtype)


def _round_up(x, m):
    return ((x + m - 1) // m) * m


def _choose_tiling(B, tm, row_gran):
    """Pick (padded batch, batch tile). Tile rows are a multiple of the dtype's sublane
    packing; prefer >=2 grid steps so both v7x TensorCores get work."""
    tm = max(_round_up(tm, row_gran), row_gran)
    B_min = _round_up(B, row_gran)
    if B_min >= 2 * tm:
        return _round_up(B, tm), tm
    if B_min >= 2 * row_gran:
        half = _round_up((B_min + 1) // 2, row_gran)
        return 2 * half, half
    return B_min, B_min


def pack_dqn_params(params, compute_dtype=jnp.bfloat16):
    """Zero-pad all (in,out)-transposed weights to 128x128 and stack into a (4,128,128)
    slab; biases into a (4,128) f32 slab. Done once, outside the kernel."""
    w_slab = jnp.zeros((4, LANE, LANE), compute_dtype)
    b_slab = jnp.zeros((4, LANE), jnp.float32)
    for idx in range(4):
        w = params[f"w{idx + 1}"]
        b = params[f"b{idx + 1}"].reshape(-1)
        w_slab = w_slab.at[idx, : w.shape[0], : w.shape[1]].set(w.astype(compute_dtype))
        b_slab = b_slab.at[idx, : b.shape[0]].set(b.astype(jnp.float32))
    return w_slab, b_slab


def dqn_forward(x, w_slab, b_slab, out_size, *, tm=256):
    """x: (B, input_size) f32. w_slab: (4,128,128), b_slab: (4,128). Returns (B, out_size) f32."""
    B, in_size = x.shape
    compute_dtype = w_slab.dtype
    itemsize = jnp.dtype(compute_dtype).itemsize
    row_gran = 8 * (4 // itemsize)  # 8 rows for f32 tiles, 16 for bf16 (sublane packing)

    B_pad, tm_eff = _choose_tiling(B, tm, row_gran)
    grid = (B_pad // tm_eff,)

    # Lane-pad the input batch once in the wrapper (padded cols hit zero weight rows).
    xp = jnp.zeros((B_pad, LANE), compute_dtype)
    xp = xp.at[:B, :in_size].set(x.astype(compute_dtype))

    # Raise the scoped VMEM limit only if the batch tile is pushed very large.
    tile_bytes = tm_eff * LANE * (itemsize + 4)              # x tile (cd) + out tile (f32)
    est = 2 * tile_bytes + w_slab.size * itemsize + b_slab.size * 4
    vmem_limit = None
    if est > 24 * 1024 * 1024:
        vmem_limit = min(int(1.5 * est), 64 * 1024 * 1024)

    out_padded = pl.pallas_call(
        dqn_kernel,
        out_shape=jax.ShapeDtypeStruct((B_pad, LANE), jnp.float32),
        grid_spec=pltpu.PrefetchScalarGridSpec(
            num_scalar_prefetch=0,
            grid=grid,
            in_specs=[
                pl.BlockSpec((tm_eff, LANE), lambda i: (i, 0)),
                # Parameter slabs: constant block index -> stay resident, no re-DMA per step.
                pl.BlockSpec(w_slab.shape, lambda i: (0, 0, 0)),
                pl.BlockSpec(b_slab.shape, lambda i: (0, 0)),
            ],
            out_specs=pl.BlockSpec((tm_eff, LANE), lambda i: (i, 0)),
        ),
        compiler_params=pltpu.CompilerParams(
            dimension_semantics=("parallel",),
            vmem_limit_bytes=vmem_limit,
        ),
    )(xp, w_slab, b_slab)

    return out_padded[:B, :out_size]


def init_dqn_params(key, input_size, output_size):
    """PyTorch nn.Linear-style init: U(-1/sqrt(fan_in), +1/sqrt(fan_in)).
    Weights stored transposed as (in, out); biases as (1, out)."""
    dims = [(input_size, 64), (64, 32), (32, 16), (16, output_size)]
    params = {}
    for idx, (fan_in, fan_out) in enumerate(dims, start=1):
        key, kw, kb = jax.random.split(key, 3)
        bound = 1.0 / jnp.sqrt(jnp.float32(fan_in))
        params[f"w{idx}"] = jax.random.uniform(
            kw, (fan_in, fan_out), jnp.float32, -bound, bound)
        params[f"b{idx}"] = jax.random.uniform(
            kb, (1, fan_out), jnp.float32, -bound, bound)
    return params


def dqn_reference(x, params):
    h = jnp.maximum(x @ params["w1"] + params["b1"], 0.0)
    h = jnp.maximum(h @ params["w2"] + params["b2"], 0.0)
    h = jnp.maximum(h @ params["w3"] + params["b3"], 0.0)
    return h @ params["w4"] + params["b4"]


if __name__ == "__main__":
    key = jax.random.PRNGKey(0)
    key, kx = jax.random.split(key)

    batch = 256        # replay-buffer-sized batch; wrapper splits it into 2 parallel tiles
    input_size = 4     # CartPole-style state dim
    output_size = 2    # two discrete actions

    x = jax.random.normal(kx, (batch, input_size), jnp.float32)
    params = init_dqn_params(key, input_size, output_size)
    ref = dqn_reference(x, params)

    # f32 path: tight numerical check of the fused/padded kernel.
    w_f32, b_f32 = pack_dqn_params(params, jnp.float32)
    out_f32 = jax.block_until_ready(dqn_forward(x, w_f32, b_f32, output_size))
    assert out_f32.shape == (batch, output_size)
    assert jnp.allclose(out_f32, ref, atol=1e-4, rtol=1e-4), "f32 kernel mismatch vs reference"

    # bf16-input / f32-accumulate path: the recommended fast path on v6e/v7x.
    w_bf16, b_bf16 = pack_dqn_params(params, jnp.bfloat16)
    out_bf16 = jax.block_until_ready(dqn_forward(x, w_bf16, b_bf16, output_size))
    assert out_bf16.shape == (batch, output_size)
    assert jnp.allclose(out_bf16, ref, atol=5e-2, rtol=5e-2), "bf16 kernel mismatch vs reference"

    print("KERNEL_OK")
</pallas_src>

<mosaic_0001>
module attributes {stable_mosaic.version = 11 : i64} {
  func.func @dqn_kernel(%arg0: i32, %arg1: memref<128x128xf32, #tpu.memory_space<vmem>>, %arg2: memref<4x128x128xf32, #tpu.memory_space<vmem>>, %arg3: memref<4x128xf32, #tpu.memory_space<vmem>>, %arg4: memref<128x128xf32, #tpu.memory_space<vmem>>) attributes {dimension_semantics = [#tpu.dimension_semantics<parallel>], iteration_bounds = array<i64: 2>, scalar_prefetch = 0 : i64, scratch_operands = 0 : i64, tpu.core_type = #tpu.core_type<tc>, window_params = [{transform_indices = @transform_0, window_bounds = array<i64: 128, 128>}, {pipeline_mode = #tpu.pipeline_mode<synchronous>, transform_indices = @transform_1, window_bounds = array<i64: 4, 128, 128>}, {pipeline_mode = #tpu.pipeline_mode<synchronous>, transform_indices = @transform_2, window_bounds = array<i64: 4, 128>}, {transform_indices = @transform_3, window_bounds = array<i64: 128, 128>}]} {
    %c0 = arith.constant 0 : index
    %c0_0 = arith.constant 0 : index
    %0 = vector.load %arg1[%c0, %c0_0] : memref<128x128xf32, #tpu.memory_space<vmem>>, vector<128x128xf32>
    %c0_1 = arith.constant 0 : index
    %c0_2 = arith.constant 0 : index
    %c0_3 = arith.constant 0 : index
    %1 = vector.load %arg2[%c0_1, %c0_2, %c0_3] : memref<4x128x128xf32, #tpu.memory_space<vmem>>, vector<1x128x128xf32>
    %2 = vector.shape_cast %1 : vector<1x128x128xf32> to vector<128x128xf32>
    %cst = arith.constant dense<0.000000e+00> : vector<128x128xf32>
    %3 = tpu.matmul %0, %2, %cst {dimension_numbers = #tpu.dot_dimension_numbers<[1], [0], [0], [1], [0, 0, 1, 1], [], []>} : vector<128x128xf32>, vector<128x128xf32>, vector<128x128xf32> -> vector<128x128xf32>
    %c0_4 = arith.constant 0 : index
    %c0_5 = arith.constant 0 : index
    %4 = vector.load %arg3[%c0_4, %c0_5] : memref<4x128xf32, #tpu.memory_space<vmem>>, vector<1x128xf32>
    %5 = vector.broadcast %4 : vector<1x128xf32> to vector<128x128xf32>
    %6 = arith.addf %3, %5 : vector<128x128xf32>
    %cst_6 = arith.constant 0.000000e+00 : f32
    %7 = vector.broadcast %cst_6 : f32 to vector<128x128xf32>
    %8 = arith.maximumf %6, %7 : vector<128x128xf32>
    %c1 = arith.constant 1 : index
    %c0_7 = arith.constant 0 : index
    %c0_8 = arith.constant 0 : index
    %9 = vector.load %arg2[%c1, %c0_7, %c0_8] : memref<4x128x128xf32, #tpu.memory_space<vmem>>, vector<1x128x128xf32>
    %10 = vector.shape_cast %9 : vector<1x128x128xf32> to vector<128x128xf32>
    %cst_9 = arith.constant dense<0.000000e+00> : vector<128x128xf32>
    %11 = tpu.matmul %8, %10, %cst_9 {dimension_numbers = #tpu.dot_dimension_numbers<[1], [0], [0], [1], [0, 0, 1, 1], [], []>} : vector<128x128xf32>, vector<128x128xf32>, vector<128x128xf32> -> vector<128x128xf32>
    %c1_10 = arith.constant 1 : index
    %c0_11 = arith.constant 0 : index
    %12 = vector.load %arg3[%c1_10, %c0_11] : memref<4x128xf32, #tpu.memory_space<vmem>>, vector<1x128xf32>
    %13 = vector.broadcast %12 : vector<1x128xf32> to vector<128x128xf32>
    %14 = arith.addf %11, %13 : vector<128x128xf32>
    %cst_12 = arith.constant 0.000000e+00 : f32
    %15 = vector.broadcast %cst_12 : f32 to vector<128x128xf32>
    %16 = arith.maximumf %14, %15 : vector<128x128xf32>
    %c2 = arith.constant 2 : index
    %c0_13 = arith.constant 0 : index
    %c0_14 = arith.constant 0 : index
    %17 = vector.load %arg2[%c2, %c0_13, %c0_14] : memref<4x128x128xf32, #tpu.memory_space<vmem>>, vector<1x128x128xf32>
    %18 = vector.shape_cast %17 : vector<1x128x128xf32> to vector<128x128xf32>
    %cst_15 = arith.constant dense<0.000000e+00> : vector<128x128xf32>
    %19 = tpu.matmul %16, %18, %cst_15 {dimension_numbers = #tpu.dot_dimension_numbers<[1], [0], [0], [1], [0, 0, 1, 1], [], []>} : vector<128x128xf32>, vector<128x128xf32>, vector<128x128xf32> -> vector<128x128xf32>
    %c2_16 = arith.constant 2 : index
    %c0_17 = arith.constant 0 : index
    %20 = vector.load %arg3[%c2_16, %c0_17] : memref<4x128xf32, #tpu.memory_space<vmem>>, vector<1x128xf32>
    %21 = vector.broadcast %20 : vector<1x128xf32> to vector<128x128xf32>
    %22 = arith.addf %19, %21 : vector<128x128xf32>
    %cst_18 = arith.constant 0.000000e+00 : f32
    %23 = vector.broadcast %cst_18 : f32 to vector<128x128xf32>
    %24 = arith.maximumf %22, %23 : vector<128x128xf32>
    %c3 = arith.constant 3 : index
    %c0_19 = arith.constant 0 : index
    %c0_20 = arith.constant 0 : index
    %25 = vector.load %arg2[%c3, %c0_19, %c0_20] : memref<4x128x128xf32, #tpu.memory_space<vmem>>, vector<1x128x128xf32>
    %26 = vector.shape_cast %25 : vector<1x128x128xf32> to vector<128x128xf32>
    %cst_21 = arith.constant dense<0.000000e+00> : vector<128x128xf32>
    %27 = tpu.matmul %24, %26, %cst_21 {dimension_numbers = #tpu.dot_dimension_numbers<[1], [0], [0], [1], [0, 0, 1, 1], [], []>} : vector<128x128xf32>, vector<128x128xf32>, vector<128x128xf32> -> vector<128x128xf32>
    %c3_22 = arith.constant 3 : index
    %c0_23 = arith.constant 0 : index
    %28 = vector.load %arg3[%c3_22, %c0_23] : memref<4x128xf32, #tpu.memory_space<vmem>>, vector<1x128xf32>
    %29 = vector.broadcast %28 : vector<1x128xf32> to vector<128x128xf32>
    %30 = arith.addf %27, %29 : vector<128x128xf32>
    %c0_24 = arith.constant 0 : index
    %c0_25 = arith.constant 0 : index
    %31 = vector.load %arg4[%c0_24, %c0_25] : memref<128x128xf32, #tpu.memory_space<vmem>>, vector<128x128xf32>
    tpu.vector_store %arg4[%c0_24, %c0_25], %30 {strides = array<i32>} : memref<128x128xf32, #tpu.memory_space<vmem>>, vector<128x128xf32>,
    return
  }
  func.func @transform_0(%arg0: i32) -> (i32, i32) {
    %c0_i32 = arith.constant 0 : i32
    %c0_i32_0 = arith.constant 0 : i32
    return %arg0, %c0_i32 : i32, i32
  }
  func.func @transform_1(%arg0: i32) -> (i32, i32, i32) {
    %c0_i32 = arith.constant 0 : i32
    %c0_i32_0 = arith.constant 0 : i32
    %c0_i32_1 = arith.constant 0 : i32
    %c0_i32_2 = arith.constant 0 : i32
    return %c0_i32, %c0_i32_0, %c0_i32_1 : i32, i32, i32
  }
  func.func @transform_2(%arg0: i32) -> (i32, i32) {
    %c0_i32 = arith.constant 0 : i32
    %c0_i32_0 = arith.constant 0 : i32
    %c0_i32_1 = arith.constant 0 : i32
    return %c0_i32, %c0_i32_0 : i32, i32
  }
  func.func @transform_3(%arg0: i32) -> (i32, i32) {
    %c0_i32 = arith.constant 0 : i32
    %c0_i32_0 = arith.constant 0 : i32
    return %arg0, %c0_i32 : i32, i32
  }
}

</mosaic_0001>

<bundles_post_ra>
// kernel: tpu_custom_call.1
= control target key start
LH: loop header
LB: loop body
LE: loop exit
PB: predicated region body
PF: predicated region fallthrough
CT: control target
= control target key end

     0   :  { %8 = vsyncpa [#allocation3], 0  ;;  %s1254_s0 = inlined_call_operand.hbm [shape: f32[256,128], index: 0, kind: input, shape index: {}]   ;;  %s1255_s1 = inlined_call_operand.hbm [shape: f32[4,128,128], index: 1, kind: input, shape index: {}]   ;;  %s1256_s2 = inlined_call_operand.hbm [shape: f32[4,128], index: 2, kind: input, shape index: {}]   ;;  %s1257_s3 = inlined_call_operand.hbm [shape: f32[256,128], index: 3, kind: output, shape index: {}]  }
   0x1   :  { %10 = vsyncpa [#allocation3 + $0x1], 0 }
   0x2   :  { %11 = vsyncpa [#allocation6], 0 }
   0x3   :  { %12 = vsyncpa [#allocation4], 0 }
   0x4   :  { %14 = vsyncpa [#allocation4 + $0x1], 0  ;;  %s1030_s12 = smov 0   ;;  %s1032_s13 = smov 0  }
   0x5   :  { %s1034_s14 = smov 0   ;;  %s1036_s15 = smov 0  }
   0x6 LB: > { %s1051_s16 = sadd.s32 4294967295, %s1002_s15   ;;  %s747_s17 = sadd.s32 4294967294, %s1002_s15   ;;  %s1002_s15 = sphi %s1036_s15, %s1267_s15   ;;  %s998_s14 = sphi %s1034_s14, %s1266_s14   ;;  %s994_s13 = sphi %s1032_s13, %s1265_s13   ;;  %s990_s12 = sphi %s1030_s12, %s1264_s12  }
   0x7   : > { %p40_p0 = scmp.ne.s32.totalorder %s994_s13, %s990_s12  ;;  %p41_p1 = scmp.eq.s32.totalorder %s1051_s16, 0 }
   0x8   : > { %p106_p2 = scmp.eq.s32.totalorder %s1051_s16, 1  ;;  %p112_p3 = scmp.eq.s32.totalorder %s747_s17, 1 }
   0x9   : > { %p1060_p4 = por %p41_p1, %p40_p0  ;;  %p748_p5 = scmp.ge.s32.totalorder %s1002_s15, 1 }
   0xa   : > { %p1065_p6 = por %p112_p3, %p40_p0  ;;  %p119_p7 = scmp.lt.s32.totalorder %s1002_s15, 3 }
   0xb   : > { %s130_s22 = sshll.u32 %s1255_s1, 4  ;;  %s1004_s24 = smov [#allocation5]   ;;  %s131_s22 = int_to_ptr.hbm [resolvable:$true] %s130_s22 }
   0xc   : > { %p1073_p8 = pnand %p748_p5, %p119_p7  ;;  %s132_s25 = sshll.u32 %s1004_s24, 4  ;;  %s133_s25 = int_to_ptr.vmem [resolvable:$true] %s132_s25 }
   0xd   : > { %s145_s28 = sshll.u32 %s1256_s2, 4  ;;  %s1005_s29 = smov 128   ;;  %s146_s28 = int_to_ptr.hbm [resolvable:$true] %s145_s28 }
   0xe   : > { %p779_p9 = pneg %p1073_p8  ;;  %s1006_s30 = smov 8  }
   0xf   : > { %s1007_s4 = smov [#allocation7]   ;;  %s1089_s6 = sadd.s32 1, %s1002_s15  }
  0x10   : > { %p780_p10 = pnand %p779_p9, %p41_p1  ;;  %s147_s5 = sshll.u32 %s1007_s4, 4  ;;  %s148_s5 = int_to_ptr.vmem [resolvable:$true] %s147_s5 }
  0x11   : > { %s27_s7 = sadd.s32 1, %s998_s14  ;;  %s24_s8 = ssub.s32 %s1002_s15, %s1089_s6 }
  0x12   : > { %782 = dma.hbm_to_vmem [thread:$0]  (!%p780_p10), %s131_s22, 8192, %s133_s25, [#allocation6], %s1005_s29, %s1005_s29, %s1006_s30  }
  0x13   : > { %785 = dma.hbm_to_vmem [thread:$0]  (!%p780_p10), %s146_s28, 64, %s148_s5, [#allocation6]  }
  0x14   : > { %p34_p12 = scmp.ne.s32.totalorder %s998_s14, %s994_s13  ;;  %p25_p13 = scmp.eq.s32.totalorder %s24_s8, 0 }
  0x15   : > { %p35_p0 = scmp.eq.s32.totalorder %s1002_s15, 0  ;;  %p796_p5 = scmp.lt.s32.totalorder %s1002_s15, 2 }
  0x16   : > { %p1099_p3 = por %p106_p2, %p34_p12  ;;  %s158_s11 = sand.u32 1, %s998_s14  }
  0x17   : > { %s1105_s10 = scalar_select %p25_p13, %s998_s14, %s27_s7  }
  0x18   : > { %p36_p7 = por %p35_p0, %p34_p12  ;;  %s752_s17 = sshll.u32 %s158_s11, 7 }
  0x19   : > { %s765_s20 = sshll.u32 %s1002_s15, 7  ;;  %s162_s25 = scalar_lea.vmem [#allocation2], %s752_s17 }
  0x1a   : > { %s167_s24 = scalar_lea.hbm %s1254_s0, %s765_s20  ;;  %s170_s26 = sshll.u32 %s162_s25, 4  ;;  %s171_s26 = int_to_ptr.vmem [resolvable:$true] %s170_s26 }
  0x1b   : > { %s168_s27 = sshll.u32 %s167_s24, 4  ;;  %p1112_p2 = pnand %p796_p5, %p36_p7  ;;  %s169_s27 = int_to_ptr.hbm [resolvable:$true] %s168_s27 }
  0x1c   : > { %s159_s4 = scalar_lea.sflag [#allocation3], %s158_s11  ;;  %s902_s5 = sshra.s32 %s169_s27, 4  ;;  %s903_s5 = int_to_ptr.hbm [resolvable:$true] %s902_s5 }
  0x1d   : > { %s904_s7 = scalar_lea.hbm %s903_s5, 128  ;;  %p906_p10 = pneg %p1112_p2 }
  0x1e   : > { %p905_p9 = scmp.ne.s32.totalorder %s903_s5, %s904_s7  ;;  %s909_s20 = scalar_lea.hbm %s1254_s0, 256 }
  0x1f   : > { %p910_p0 = scmp.lt.s32.totalorder %s903_s5, %s1254_s0  ;;  %p911_p5 = scmp.lt.s32.totalorder %s909_s20, %s904_s7 }
  0x20   : > { %p907_p12 = pnand %p906_p10, %p905_p9 }
  0x21   : > { %p912_p7 = por %p911_p5, %p910_p0 }
  0x22   : > { %p908_p13 = pneg %p907_p12 }
  0x24   : > { %p913_p11 = pnand %p912_p7, %p908_p13 }
  0x26   : > { %916 = shalt.err (!%p913_p11)
}
  0x27   : > { %789 = dma.hbm_to_vmem [thread:$0]  (!%p1112_p2), %s169_s27, 2048, %s171_s26, %s159_s4, %s1005_s29, %s1005_s29, %s1006_s30  }
  0x28   : > { %182 = sbr.rel (%p1073_p8) target bundleno = 734 (0x2de), region = 32  ;;  %s1132_s11 = sand.u32 (!%p1073_p8), 1, %s994_s13  }
  0x29   : > { %s756_s24 = sshll.u32 (!%p1073_p8), %s1132_s11, 7  ;;  %s185_s25 = scalar_lea.sflag (!%p1073_p8), [#allocation3], %s1132_s11 }
  0x2a   : > { %s1138_s5 = scalar_lea.vmem (!%p1073_p8), [#allocation2], %s756_s24 }
  0x2d   : > { %977 = dma.done.wait (%p1060_p4), %s185_s25, 2048  }
  0x2e   : > { %979 = vsyncadd (%p1060_p4), %s185_s25, 4294965248 }
  0x2f   : > { %981 = dma.done.wait (%p41_p1), [#allocation6], 8256  }
  0x30   : > { %983 = vsyncadd (%p41_p1), [#allocation6], 4294959040  ;;  %v255_v0 = vld [vmem:[#allocation5 + $0x78] sm:$0xff]  ;;  %v254_v1 = vld [vmem:[#allocation5 + $0x70] sm:$0xff]  ;;  %s1202_s18 = scalar_lea.vmem [#allocation8], %s756_s24  ;;  %s766_s23 = sshll.u32 %s1051_s16, 7 }
  0x31   : > { %258 = vmatpush.msra.mxu0 %v255_v0  ;;  %v253_v2 = vld [vmem:[#allocation5 + $0x68] sm:$0xff]  ;;  %v252_v3 = vld [vmem:[#allocation5 + $0x60] sm:$0xff]  ;;  %v251_v4 = vld [vmem:[#allocation5 + $0x58] sm:$0xff]  ;;  %s651_s26 = scalar_lea.hbm %s1257_s3, %s766_s23  ;;  %s652_s27 = sshll.u32 %s1202_s18, 4  ;;  %s653_s27 = int_to_ptr.vmem [resolvable:$true] %s652_s27 }
  0x32   : > { %v250_v5 = vld [vmem:[#allocation5 + $0x50] sm:$0xff]  ;;  %v249_v6 = vld [vmem:[#allocation5 + $0x48] sm:$0xff]  ;;  %v248_v7 = vld [vmem:[#allocation5 + $0x40] sm:$0xff]  ;;  %s654_s28 = sshll.u32 %s651_s26, 4  ;;  %s640_s4 = scalar_lea.sflag [#allocation4], %s1132_s11  ;;  %s655_s28 = int_to_ptr.hbm [resolvable:$true] %s654_s28 }
  0x33   : > { %259 = vmatpush.msra.mxu0 %v254_v1  ;;  %v247_v8 = vld [vmem:[#allocation5 + $0x38] sm:$0xff]  ;;  %v246_v9 = vld [vmem:[#allocation5 + $0x30] sm:$0xff]  ;;  %v245_v10 = vld [vmem:[#allocation5 + $0x28] sm:$0xff]  ;;  %s946_s7 = sshra.s32 %s655_s28, 4  ;;  %s952_s20 = scalar_lea.hbm %s1257_s3, 256  ;;  %s947_s7 = int_to_ptr.hbm [resolvable:$true] %s946_s7 }
  0x34   : > { %v244_v11 = vld [vmem:[#allocation5 + $0x20] sm:$0xff]  ;;  %v243_v12 = vld [vmem:[#allocation5 + $0x18] sm:$0xff]  ;;  %v242_v13 = vld [vmem:[#allocation5 + $0x10] sm:$0xff]  ;;  %s948_s8 = scalar_lea.hbm %s947_s7, 128  ;;  %p953_p11 = scmp.lt.s32.totalorder %s947_s7, %s1257_s3 }
  0x35   : > { %260 = vmatpush.msra.mxu0 %v253_v2  ;;  %v241_v14 = vld [vmem:[#allocation5 + $0x8] sm:$0xff]  ;;  %v240_v15 = vld [vmem:[#allocation5] sm:$0xff]  ;;  %v226_v18 = vld [vmem:[%s1138_s5 + $0x10] sm:$0xff]  ;;  %p949_p1 = scmp.ne.s32.totalorder %s947_s7, %s948_s8  ;;  %p954_p2 = scmp.lt.s32.totalorder %s952_s20, %s948_s8 }
  0x36   : > { %v224_v16 = vld [vmem:[%s1138_s5] sm:$0xff]  ;;  %v225_v17 = vld [vmem:[%s1138_s5 + $0x8] sm:$0xff]  ;;  %v227_v19 = vld [vmem:[%s1138_s5 + $0x18] sm:$0xff] }
  0x37   : > { %261 = vmatpush.msra.mxu0 %v252_v3  ;;  %v228_v20 = vld [vmem:[%s1138_s5 + $0x20] sm:$0xff]  ;;  %v229_v21 = vld [vmem:[%s1138_s5 + $0x28] sm:$0xff]  ;;  %v230_v22 = vld [vmem:[%s1138_s5 + $0x30] sm:$0xff]  ;;  %p950_p4 = pnand %p949_p1, %p1099_p3  ;;  %p955_p9 = por %p954_p2, %p953_p11 }
  0x38   : > { %v231_v23 = vld [vmem:[%s1138_s5 + $0x38] sm:$0xff]  ;;  %v232_v24 = vld [vmem:[%s1138_s5 + $0x40] sm:$0xff]  ;;  %v354_v26 = vld [vmem:[#allocation5 + $0xf0] sm:$0xff] }
  0x39   : > { %262 = vmatpush.msra.mxu0 %v251_v4  ;;  %v355_v25 = vld [vmem:[#allocation5 + $0xf8] sm:$0xff]  ;;  %v353_v27 = vld [vmem:[#allocation5 + $0xe8] sm:$0xff]  ;;  %v352_v29 = vld [vmem:[#allocation5 + $0xe0] sm:$0xff]  ;;  %p951_p8 = pneg %p950_p4 }
  0x3a   : > { %358 = vmatpush.msra.mxu1 %v355_v25  ;;  %v233_v28 = vld [vmem:[%s1138_s5 + $0x48] sm:$0xff]  ;;  %v351_v30 = vld [vmem:[#allocation5 + $0xd8] sm:$0xff]  ;;  %v350_v31 = vld [vmem:[#allocation5 + $0xd0] sm:$0xff] }
  0x3b   : > { %263 = vmatpush.msra.mxu0 %v250_v5  ;;  %v349_v32 = vld [vmem:[#allocation5 + $0xc8] sm:$0xff]  ;;  %v234_v33 = vld [vmem:[%s1138_s5 + $0x50] sm:$0xff]  ;;  %v348_v34 = vld [vmem:[#allocation5 + $0xc0] sm:$0xff]  ;;  %p956_p10 = pnand %p955_p9, %p951_p8 }
  0x3c   : > { %359 = vmatpush.msra.mxu1 %v354_v26  ;;  %v347_v35 = vld [vmem:[#allocation5 + $0xb8] sm:$0xff]  ;;  %v346_v36 = vld [vmem:[#allocation5 + $0xb0] sm:$0xff]  ;;  %v345_v37 = vld [vmem:[#allocation5 + $0xa8] sm:$0xff] }
  0x3d   : > { %264 = vmatpush.msra.mxu0 %v249_v6  ;;  %v235_v38 = vld [vmem:[%s1138_s5 + $0x58] sm:$0xff]  ;;  %v344_v39 = vld [vmem:[#allocation5 + $0xa0] sm:$0xff]  ;;  %v342_v41 = vld [vmem:[#allocation5 + $0x90] sm:$0xff] }
  0x3e   : > { %360 = vmatpush.msra.mxu1 %v353_v27  ;;  %v343_v40 = vld [vmem:[#allocation5 + $0x98] sm:$0xff]  ;;  %v236_v42 = vld [vmem:[%s1138_s5 + $0x60] sm:$0xff]  ;;  %v341_v43 = vld [vmem:[#allocation5 + $0x88] sm:$0xff] }
  0x3f   : > { %265 = vmatpush.msra.mxu0 %v248_v7  ;;  %v340_v44 = vld [vmem:[#allocation5 + $0x80] sm:$0xff]  ;;  %v237_v45 = vld [vmem:[%s1138_s5 + $0x68] sm:$0xff]  ;;  %v238_v46 = vld [vmem:[%s1138_s5 + $0x70] sm:$0xff] }
  0x40   : > { %361 = vmatpush.msra.mxu1 %v352_v29  ;;  %v239_v47 = vld [vmem:[%s1138_s5 + $0x78] sm:$0xff]  ;;  %v1164_v48 = vld [vmem:[#allocation7] ss:$0 sm:$0xff]  ;;  %v446_v29 = vld [vmem:[#allocation5 + $0x130] sm:$0xff] }
  0x41   : > { %266 = vmatpush.msra.mxu0 %v247_v8  ;;  %v448_v25 = vld [vmem:[#allocation5 + $0x140] sm:$0xff]  ;;  %v447_v26 = vld [vmem:[#allocation5 + $0x138] sm:$0xff] }
  0x42   : > { %362 = vmatpush.msra.mxu1 %v351_v30 }
  0x43   : > { %267 = vmatpush.msra.mxu0 %v246_v9 }
  0x44   : > { %363 = vmatpush.msra.mxu1 %v350_v31  ;;  %v445_v31 = vld [vmem:[#allocation5 + $0x128] sm:$0xff] }
  0x45   : > { %268 = vmatpush.msra.mxu0 %v245_v10 }
  0x46   : > { %364 = vmatpush.msra.mxu1 %v349_v32  ;;  %v444_v32 = vld [vmem:[#allocation5 + $0x120] sm:$0xff] }
  0x47   : > { %269 = vmatpush.msra.mxu0 %v244_v11 }
  0x48   : > { %365 = vmatpush.msra.mxu1 %v348_v34 }
  0x49   : > { %270 = vmatpush.msra.mxu0 %v243_v12  ;;  %v455_v12 = vld [vmem:[#allocation5 + $0x178] sm:$0xff] }
  0x4a   : > { %366 = vmatpush.msra.mxu1 %v347_v35  ;;  %458 = vmatpush.msra.mxu2 %v455_v12 }
  0x4b   : > { %271 = vmatpush.msra.mxu0 %v242_v13 }
  0x4c   : > { %367 = vmatpush.msra.mxu1 %v346_v36  ;;  %v442_v36 = vld [vmem:[#allocation5 + $0x110] sm:$0xff] }
  0x4d   : > { %272 = vmatpush.msra.mxu0 %v241_v14 }
  0x4e   : > { %368 = vmatpush.msra.mxu1 %v345_v37 }
  0x4f   : > { %273 = vmatpush.msra.mxu0 %v240_v15  ;;  %v454_v15 = vld [vmem:[#allocation5 + $0x170] sm:$0xff] }
  0x50   : > { %274 = vmatmul.f32.vlgmr.msra.gmra.mxu0 %v224_v16  ;;  %369 = vmatpush.msra.mxu1 %v344_v39  ;;  %v440_v39 = vld [vmem:[#allocation5 + $0x100] sm:$0xff] }
  0x51   : > { %459 = vmatpush.msra.mxu2 %v454_v15 }
  0x52   : > { %370 = vmatpush.msra.mxu1 %v343_v40 }
  0x54   : > { %371 = vmatpush.msra.mxu1 %v342_v41 }
  0x56   : > { %372 = vmatpush.msra.mxu1 %v341_v43 }
  0x58   : > { %277 = vmatmul.f32.gmra.mxu0 %v225_v17  ;;  %373 = vmatpush.msra.mxu1 %v340_v44  ;;  %v453_v17 = vld [vmem:[#allocation5 + $0x168] sm:$0xff] }
  0x59   : > { %460 = vmatpush.msra.mxu2 %v453_v17  ;;  %v554_v17 = vld [vmem:[#allocation5 + $0x1f0] sm:$0xff] }
  0x60   : > { %280 = vmatmul.f32.gmra.mxu0 %v226_v18  ;;  %v452_v18 = vld [vmem:[#allocation5 + $0x160] sm:$0xff] }
  0x61   : > { %461 = vmatpush.msra.mxu2 %v452_v18 }
  0x68   : > { %283 = vmatmul.f32.gmra.mxu0 %v227_v19  ;;  %v451_v19 = vld [vmem:[#allocation5 + $0x158] sm:$0xff] }
  0x69   : > { %462 = vmatpush.msra.mxu2 %v451_v19 }
  0x70   : > { %286 = vmatmul.f32.gmra.mxu0 %v228_v20 }
  0x78   : > { %289 = vmatmul.f32.gmra.mxu0 %v229_v21 }
  0x80   : > { %292 = vmatmul.f32.gmra.mxu0 %v230_v22  ;;  %v450_v22 = vld [vmem:[#allocation5 + $0x150] sm:$0xff] }
  0x81   : > { %463 = vmatpush.msra.mxu2 %v450_v22  ;;  %v552_v22 = vld [vmem:[#allocation5 + $0x1e0] sm:$0xff] }
  0x88   : > { %295 = vmatmul.f32.gmra.mxu0 %v231_v23 }
  0x90   : > { %298 = vmatmul.f32.gmra.mxu0 %v232_v24  ;;  %v449_v24 = vld [vmem:[#allocation5 + $0x148] sm:$0xff] }
  0x91   : > { %464 = vmatpush.msra.mxu2 %v449_v24  ;;  %v550_v24 = vld [vmem:[#allocation5 + $0x1d0] sm:$0xff] }
  0x93   : > { %465 = vmatpush.msra.mxu2 %v448_v25 }
  0x95   : > { %466 = vmatpush.msra.mxu2 %v447_v26 }
  0x97   : > { %467 = vmatpush.msra.mxu2 %v446_v29  ;;  %v548_v29 = vld [vmem:[#allocation5 + $0x1c0] sm:$0xff] }
  0x98   : > { %301 = vmatmul.f32.gmra.mxu0 %v233_v28 }
  0x99   : > { %468 = vmatpush.msra.mxu2 %v445_v31  ;;  %v546_v31 = vld [vmem:[#allocation5 + $0x1b0] sm:$0xff] }
  0x9b   : > { %469 = vmatpush.msra.mxu2 %v444_v32  ;;  %v545_v32 = vld [vmem:[#allocation5 + $0x1a8] sm:$0xff] }
  0xa0   : > { %304 = vmatmul.f32.gmra.mxu0 %v234_v33  ;;  %v443_v33 = vld [vmem:[#allocation5 + $0x118] sm:$0xff] }
  0xa1   : > { %470 = vmatpush.msra.mxu2 %v443_v33 }
  0xa3   : > { %471 = vmatpush.msra.mxu2 %v442_v36 }
  0xa8   : > { %307 = vmatmul.f32.gmra.mxu0 %v235_v38  ;;  %v441_v38 = vld [vmem:[#allocation5 + $0x108] sm:$0xff] }
  0xa9   : > { %472 = vmatpush.msra.mxu2 %v441_v38  ;;  %v542_v38 = vld [vmem:[#allocation5 + $0x190] sm:$0xff] }
  0xab   : > { %473 = vmatpush.msra.mxu2 %v440_v39 }
  0xb0   : > { %310 = vmatmul.f32.gmra.mxu0 %v236_v42 }
  0xb8   : > { %313 = vmatmul.f32.gmra.mxu0 %v237_v45 }
  0xc0   : > { %316 = vmatmul.f32.gmra.mxu0 %v238_v46 }
  0xc8   : > { %319 = vmatmul.f32.gmra.mxu0 %v239_v47 }
  0xcd   : > { %v275_v49 = vpop.f32.mrf.mxu0 }
  0xce   : > { %v276_v50 = vadd.f32 %v1164_v48, %v275_v49 }
  0xd0   : > { %v323_v51 = vmax.f32 %v276_v50, 0.0  ;;  %v1182_v50 = vld [vmem:[#allocation7 + $0x1] ss:$0 sm:$0xff] }
  0xd2   : > { %374 = vmatmul.f32.vlgmr.msra.gmra.mxu1 %v323_v51 }
  0xd5   : > { %v278_v52 = vpop.f32.mrf.mxu0 }
  0xd6   : > { %v279_v53 = vadd.f32 %v1164_v48, %v278_v52 }
  0xd8   : > { %v324_v54 = vmax.f32 %v279_v53, 0.0 }
  0xda   : > { %377 = vmatmul.f32.gmra.mxu1 %v324_v54 }
  0xdd   : > { %v281_v55 = vpop.f32.mrf.mxu0 }
  0xde   : > { %v282_v56 = vadd.f32 %v1164_v48, %v281_v55 }
  0xe0   : > { %v325_v57 = vmax.f32 %v282_v56, 0.0 }
  0xe2   : > { %380 = vmatmul.f32.gmra.mxu1 %v325_v57 }
  0xe5   : > { %v284_v58 = vpop.f32.mrf.mxu0 }
  0xe6   : > { %v285_v59 = vadd.f32 %v1164_v48, %v284_v58 }
  0xe8   : > { %v326_v60 = vmax.f32 %v285_v59, 0.0 }
  0xea   : > { %383 = vmatmul.f32.gmra.mxu1 %v326_v60 }
  0xed   : > { %v287_v61 = vpop.f32.mrf.mxu0 }
  0xee   : > { %v288_v62 = vadd.f32 %v1164_v48, %v287_v61 }
  0xf0   : > { %v327_v63 = vmax.f32 %v288_v62, 0.0 }
  0xf2   : > { %386 = vmatmul.f32.gmra.mxu1 %v327_v63 }
  0xf5   : > { %v290_v0 = vpop.f32.mrf.mxu0 }
  0xf6   : > { %v291_v1 = vadd.f32 %v1164_v48, %v290_v0 }
  0xf8   : > { %v328_v2 = vmax.f32 %v291_v1, 0.0 }
  0xfa   : > { %389 = vmatmul.f32.gmra.mxu1 %v328_v2 }
  0xfd   : > { %v293_v3 = vpop.f32.mrf.mxu0 }
  0xfe   : > { %v294_v4 = vadd.f32 %v1164_v48, %v293_v3 }
 0x100   : > { %v329_v5 = vmax.f32 %v294_v4, 0.0 }
 0x102   : > { %392 = vmatmul.f32.gmra.mxu1 %v329_v5 }
 0x105   : > { %v296_v6 = vpop.f32.mrf.mxu0 }
 0x106   : > { %v297_v7 = vadd.f32 %v1164_v48, %v296_v6 }
 0x108   : > { %v330_v8 = vmax.f32 %v297_v7, 0.0 }
 0x10a   : > { %395 = vmatmul.f32.gmra.mxu1 %v330_v8 }
 0x10d   : > { %v299_v9 = vpop.f32.mrf.mxu0 }
 0x10e   : > { %v300_v10 = vadd.f32 %v1164_v48, %v299_v9 }
 0x110   : > { %v331_v11 = vmax.f32 %v300_v10, 0.0 }
 0x112   : > { %398 = vmatmul.f32.gmra.mxu1 %v331_v11 }
 0x115   : > { %v302_v13 = vpop.f32.mrf.mxu0 }
 0x116   : > { %v303_v14 = vadd.f32 %v1164_v48, %v302_v13 }
 0x118   : > { %v332_v16 = vmax.f32 %v303_v14, 0.0 }
 0x11a   : > { %401 = vmatmul.f32.gmra.mxu1 %v332_v16  ;;  %v555_v16 = vld [vmem:[#allocation5 + $0x1f8] sm:$0xff] }
 0x11b   : > { %558 = vmatpush.msra.mxu3 %v555_v16 }
 0x11d   : > { %v305_v20 = vpop.f32.mrf.mxu0  ;;  %559 = vmatpush.msra.mxu3 %v554_v17 }
 0x11e   : > { %v306_v21 = vadd.f32 %v1164_v48, %v305_v20  ;;  %v553_v20 = vld [vmem:[#allocation5 + $0x1e8] sm:$0xff] }
 0x11f   : > { %560 = vmatpush.msra.mxu3 %v553_v20 }
 0x120   : > { %v333_v23 = vmax.f32 %v306_v21, 0.0 }
 0x121   : > { %561 = vmatpush.msra.mxu3 %v552_v22 }
 0x122   : > { %404 = vmatmul.f32.gmra.mxu1 %v333_v23  ;;  %v551_v23 = vld [vmem:[#allocation5 + $0x1d8] sm:$0xff] }
 0x123   : > { %562 = vmatpush.msra.mxu3 %v551_v23 }
 0x125   : > { %v308_v27 = vpop.f32.mrf.mxu0  ;;  %563 = vmatpush.msra.mxu3 %v550_v24 }
 0x126   : > { %v309_v28 = vadd.f32 %v1164_v48, %v308_v27  ;;  %v549_v27 = vld [vmem:[#allocation5 + $0x1c8] sm:$0xff] }
 0x127   : > { %564 = vmatpush.msra.mxu3 %v549_v27 }
 0x128   : > { %v334_v30 = vmax.f32 %v309_v28, 0.0 }
 0x129   : > { %565 = vmatpush.msra.mxu3 %v548_v29 }
 0x12a   : > { %407 = vmatmul.f32.gmra.mxu1 %v334_v30  ;;  %v547_v30 = vld [vmem:[#allocation5 + $0x1b8] sm:$0xff] }
 0x12b   : > { %566 = vmatpush.msra.mxu3 %v547_v30 }
 0x12d   : > { %v311_v34 = vpop.f32.mrf.mxu0  ;;  %567 = vmatpush.msra.mxu3 %v546_v31 }
 0x12e   : > { %v312_v35 = vadd.f32 %v1164_v48, %v311_v34 }
 0x12f   : > { %568 = vmatpush.msra.mxu3 %v545_v32 }
 0x130   : > { %v335_v37 = vmax.f32 %v312_v35, 0.0  ;;  %v544_v35 = vld [vmem:[#allocation5 + $0x1a0] sm:$0xff] }
 0x131   : > { %569 = vmatpush.msra.mxu3 %v544_v35  ;;  %v841_v35 = vld [vmem:[#allocation7 + $0x3] ss:$0 sm:$0xff] }
 0x132   : > { %410 = vmatmul.f32.gmra.mxu1 %v335_v37  ;;  %v543_v37 = vld [vmem:[#allocation5 + $0x198] sm:$0xff] }
 0x133   : > { %570 = vmatpush.msra.mxu3 %v543_v37 }
 0x135   : > { %v314_v40 = vpop.f32.mrf.mxu0  ;;  %571 = vmatpush.msra.mxu3 %v542_v38 }
 0x136   : > { %v315_v41 = vadd.f32 %v1164_v48, %v314_v40 }
 0x138   : > { %v336_v42 = vmax.f32 %v315_v41, 0.0  ;;  %v541_v41 = vld [vmem:[#allocation5 + $0x188] sm:$0xff] }
 0x139   : > { %572 = vmatpush.msra.mxu3 %v541_v41 }
 0x13a   : > { %413 = vmatmul.f32.gmra.mxu1 %v336_v42 }
 0x13d   : > { %v317_v43 = vpop.f32.mrf.mxu0 }
 0x13e   : > { %v318_v44 = vadd.f32 %v1164_v48, %v317_v43  ;;  %v540_v43 = vld [vmem:[#allocation5 + $0x180] sm:$0xff] }
 0x13f   : > { %573 = vmatpush.msra.mxu3 %v540_v43 }
 0x140   : > { %v337_v45 = vmax.f32 %v318_v44, 0.0 }
 0x142   : > { %416 = vmatmul.f32.gmra.mxu1 %v337_v45 }
 0x145   : > { %v320_v46 = vpop.f32.mrf.mxu0 }
 0x146   : > { %v321_v47 = vadd.f32 %v1164_v48, %v320_v46 }
 0x148   : > { %v338_v49 = vmax.f32 %v321_v47, 0.0 }
 0x14a   : > { %419 = vmatmul.f32.gmra.mxu1 %v338_v49 }
 0x14f   : > { %v375_v51 = vpop.f32.mrf.mxu1 }
 0x150   : > { %v376_v52 = vadd.f32 %v1182_v50, %v375_v51 }
 0x152   : > { %v423_v53 = vmax.f32 %v376_v52, 0.0  ;;  %v840_v52 = vld [vmem:[#allocation7 + $0x2] ss:$0 sm:$0xff] }
 0x154   : > { %474 = vmatmul.f32.vlgmr.msra.gmra.mxu2 %v423_v53 }
 0x157   : > { %v378_v54 = vpop.f32.mrf.mxu1 }
 0x158   : > { %v379_v55 = vadd.f32 %v1182_v50, %v378_v54 }
 0x15a   : > { %v424_v56 = vmax.f32 %v379_v55, 0.0 }
 0x15c   : > { %477 = vmatmul.f32.gmra.mxu2 %v424_v56 }
 0x15f   : > { %v381_v57 = vpop.f32.mrf.mxu1 }
 0x160   : > { %v382_v58 = vadd.f32 %v1182_v50, %v381_v57 }
 0x162   : > { %v425_v59 = vmax.f32 %v382_v58, 0.0 }
 0x164   : > { %480 = vmatmul.f32.gmra.mxu2 %v425_v59 }
 0x167   : > { %v384_v48 = vpop.f32.mrf.mxu1 }
 0x168   : > { %v385_v60 = vadd.f32 %v1182_v50, %v384_v48 }
 0x16a   : > { %v426_v61 = vmax.f32 %v385_v60, 0.0 }
 0x16c   : > { %483 = vmatmul.f32.gmra.mxu2 %v426_v61 }
 0x16f   : > { %v387_v62 = vpop.f32.mrf.mxu1 }
 0x170   : > { %v388_v63 = vadd.f32 %v1182_v50, %v387_v62 }
 0x172   : > { %v427_v0 = vmax.f32 %v388_v63, 0.0 }
 0x174   : > { %486 = vmatmul.f32.gmra.mxu2 %v427_v0 }
 0x177   : > { %v390_v1 = vpop.f32.mrf.mxu1 }
 0x178   : > { %v391_v2 = vadd.f32 %v1182_v50, %v390_v1 }
 0x17a   : > { %v428_v3 = vmax.f32 %v391_v2, 0.0 }
 0x17c   : > { %489 = vmatmul.f32.gmra.mxu2 %v428_v3 }
 0x17f   : > { %v393_v4 = vpop.f32.mrf.mxu1 }
 0x180   : > { %v394_v5 = vadd.f32 %v1182_v50, %v393_v4 }
 0x182   : > { %v429_v6 = vmax.f32 %v394_v5, 0.0 }
 0x184   : > { %492 = vmatmul.f32.gmra.mxu2 %v429_v6 }
 0x187   : > { %v396_v7 = vpop.f32.mrf.mxu1 }
 0x188   : > { %v397_v8 = vadd.f32 %v1182_v50, %v396_v7 }
 0x18a   : > { %v430_v9 = vmax.f32 %v397_v8, 0.0 }
 0x18c   : > { %495 = vmatmul.f32.gmra.mxu2 %v430_v9 }
 0x18f   : > { %v399_v10 = vpop.f32.mrf.mxu1 }
 0x190   : > { %v400_v11 = vadd.f32 %v1182_v50, %v399_v10 }
 0x192   : > { %v431_v12 = vmax.f32 %v400_v11, 0.0 }
 0x194   : > { %498 = vmatmul.f32.gmra.mxu2 %v431_v12 }
 0x197   : > { %v402_v13 = vpop.f32.mrf.mxu1 }
 0x198   : > { %v403_v14 = vadd.f32 %v1182_v50, %v402_v13 }
 0x19a   : > { %v432_v15 = vmax.f32 %v403_v14, 0.0 }
 0x19c   : > { %501 = vmatmul.f32.gmra.mxu2 %v432_v15 }
 0x19f   : > { %v405_v18 = vpop.f32.mrf.mxu1 }
 0x1a0   : > { %v406_v19 = vadd.f32 %v1182_v50, %v405_v18 }
 0x1a2   : > { %v433_v21 = vmax.f32 %v406_v19, 0.0 }
 0x1a4   : > { %504 = vmatmul.f32.gmra.mxu2 %v433_v21 }
 0x1a7   : > { %v408_v25 = vpop.f32.mrf.mxu1 }
 0x1a8   : > { %v409_v26 = vadd.f32 %v1182_v50, %v408_v25 }
 0x1aa   : > { %v434_v28 = vmax.f32 %v409_v26, 0.0 }
 0x1ac   : > { %507 = vmatmul.f32.gmra.mxu2 %v434_v28 }
 0x1af   : > { %v411_v33 = vpop.f32.mrf.mxu1 }
 0x1b0   : > { %v412_v34 = vadd.f32 %v1182_v50, %v411_v33 }
 0x1b2   : > { %v435_v36 = vmax.f32 %v412_v34, 0.0 }
 0x1b4   : > { %510 = vmatmul.f32.gmra.mxu2 %v435_v36 }
 0x1b7   : > { %v414_v39 = vpop.f32.mrf.mxu1 }
 0x1b8   : > { %v415_v40 = vadd.f32 %v1182_v50, %v414_v39 }
 0x1ba   : > { %v436_v42 = vmax.f32 %v415_v40, 0.0 }
 0x1bc   : > { %513 = vmatmul.f32.gmra.mxu2 %v436_v42 }
 0x1bf   : > { %v417_v44 = vpop.f32.mrf.mxu1 }
 0x1c0   : > { %v418_v45 = vadd.f32 %v1182_v50, %v417_v44 }
 0x1c2   : > { %v437_v46 = vmax.f32 %v418_v45, 0.0 }
 0x1c4   : > { %516 = vmatmul.f32.gmra.mxu2 %v437_v46 }
 0x1c7   : > { %v420_v47 = vpop.f32.mrf.mxu1 }
 0x1c8   : > { %v421_v49 = vadd.f32 %v1182_v50, %v420_v47 }
 0x1ca   : > { %v438_v51 = vmax.f32 %v421_v49, 0.0 }
 0x1cc   : > { %519 = vmatmul.f32.gmra.mxu2 %v438_v51 }
 0x1d7   : > { %v475_v53 = vpop.f32.mrf.mxu2 }
 0x1d8   : > { %v476_v54 = vadd.f32 %v840_v52, %v475_v53 }
 0x1da   : > { %v523_v55 = vmax.f32 %v476_v54, 0.0 }
 0x1dc   : > { %574 = vmatmul.f32.vlgmr.msra.gmra.mxu3 %v523_v55 }
 0x1df   : > { %v478_v56 = vpop.f32.mrf.mxu2 }
 0x1e0   : > { %v479_v57 = vadd.f32 %v840_v52, %v478_v56 }
 0x1e2   : > { %v524_v58 = vmax.f32 %v479_v57, 0.0 }
 0x1e4   : > { %577 = vmatmul.f32.gmra.mxu3 %v524_v58 }
 0x1e7   : > { %v481_v59 = vpop.f32.mrf.mxu2 }
 0x1e8   : > { %v482_v48 = vadd.f32 %v840_v52, %v481_v59 }
 0x1ea   : > { %v525_v60 = vmax.f32 %v482_v48, 0.0 }
 0x1ec   : > { %580 = vmatmul.f32.gmra.mxu3 %v525_v60 }
 0x1ef   : > { %v484_v61 = vpop.f32.mrf.mxu2 }
 0x1f0   : > { %v485_v62 = vadd.f32 %v840_v52, %v484_v61 }
 0x1f2   : > { %v526_v63 = vmax.f32 %v485_v62, 0.0 }
 0x1f4   : > { %583 = vmatmul.f32.gmra.mxu3 %v526_v63 }
 0x1f7   : > { %v487_v50 = vpop.f32.mrf.mxu2 }
 0x1f8   : > { %v488_v0 = vadd.f32 %v840_v52, %v487_v50 }
 0x1fa   : > { %v527_v1 = vmax.f32 %v488_v0, 0.0 }
 0x1fc   : > { %586 = vmatmul.f32.gmra.mxu3 %v527_v1 }
 0x1ff   : > { %v490_v2 = vpop.f32.mrf.mxu2 }
 0x200   : > { %v491_v3 = vadd.f32 %v840_v52, %v490_v2 }
 0x202   : > { %v528_v4 = vmax.f32 %v491_v3, 0.0 }
 0x204   : > { %589 = vmatmul.f32.gmra.mxu3 %v528_v4 }
 0x207   : > { %v493_v5 = vpop.f32.mrf.mxu2 }
 0x208   : > { %v494_v6 = vadd.f32 %v840_v52, %v493_v5 }
 0x20a   : > { %v529_v7 = vmax.f32 %v494_v6, 0.0 }
 0x20c   : > { %592 = vmatmul.f32.gmra.mxu3 %v529_v7 }
 0x20f   : > { %v496_v8 = vpop.f32.mrf.mxu2 }
 0x210   : > { %v497_v9 = vadd.f32 %v840_v52, %v496_v8 }
 0x212   : > { %v530_v10 = vmax.f32 %v497_v9, 0.0 }
 0x214   : > { %595 = vmatmul.f32.gmra.mxu3 %v530_v10 }
 0x217   : > { %v499_v11 = vpop.f32.mrf.mxu2 }
 0x218   : > { %v500_v12 = vadd.f32 %v840_v52, %v499_v11 }
 0x21a   : > { %v531_v13 = vmax.f32 %v500_v12, 0.0 }
 0x21c   : > { %598 = vmatmul.f32.gmra.mxu3 %v531_v13 }
 0x21f   : > { %v502_v14 = vpop.f32.mrf.mxu2 }
 0x220   : > { %v503_v15 = vadd.f32 %v840_v52, %v502_v14 }
 0x222   : > { %v532_v16 = vmax.f32 %v503_v15, 0.0 }
 0x224   : > { %601 = vmatmul.f32.gmra.mxu3 %v532_v16 }
 0x227   : > { %v505_v17 = vpop.f32.mrf.mxu2 }
 0x228   : > { %v506_v18 = vadd.f32 %v840_v52, %v505_v17 }
 0x22a   : > { %v533_v19 = vmax.f32 %v506_v18, 0.0 }
 0x22c   : > { %604 = vmatmul.f32.gmra.mxu3 %v533_v19 }
 0x22f   : > { %v508_v20 = vpop.f32.mrf.mxu2 }
 0x230   : > { %v509_v21 = vadd.f32 %v840_v52, %v508_v20 }
 0x232   : > { %v534_v22 = vmax.f32 %v509_v21, 0.0 }
 0x234   : > { %607 = vmatmul.f32.gmra.mxu3 %v534_v22 }
 0x237   : > { %v511_v23 = vpop.f32.mrf.mxu2 }
 0x238   : > { %v512_v24 = vadd.f32 %v840_v52, %v511_v23 }
 0x23a   : > { %v535_v25 = vmax.f32 %v512_v24, 0.0 }
 0x23c   : > { %610 = vmatmul.f32.gmra.mxu3 %v535_v25 }
 0x23f   : > { %v514_v26 = vpop.f32.mrf.mxu2 }
 0x240   : > { %v515_v27 = vadd.f32 %v840_v52, %v514_v26 }
 0x242   : > { %v536_v28 = vmax.f32 %v515_v27, 0.0 }
 0x244   : > { %613 = vmatmul.f32.gmra.mxu3 %v536_v28 }
 0x247   : > { %v517_v29 = vpop.f32.mrf.mxu2 }
 0x248   : > { %v518_v30 = vadd.f32 %v840_v52, %v517_v29 }
 0x24a   : > { %v537_v31 = vmax.f32 %v518_v30, 0.0 }
 0x24c   : > { %616 = vmatmul.f32.gmra.mxu3 %v537_v31 }
 0x24f   : > { %v520_v32 = vpop.f32.mrf.mxu2 }
 0x250   : > { %v521_v33 = vadd.f32 %v840_v52, %v520_v32 }
 0x252   : > { %v538_v34 = vmax.f32 %v521_v33, 0.0 }
 0x254   : > { %619 = vmatmul.f32.gmra.mxu3 %v538_v34 }
 0x25f   : > { %v575_v36 = vpop.f32.mrf.mxu3 }
 0x260   : > { %v576_v37 = vadd.f32 %v841_v35, %v575_v36 }
 0x262   : > { %623 = vst [vmem:[%s1202_s18] sm:$0xff] %v576_v37 }
 0x267   : > { %v578_v38 = vpop.f32.mrf.mxu3 }
 0x268   : > { %v579_v39 = vadd.f32 %v841_v35, %v578_v38 }
 0x26a   : > { %624 = vst [vmem:[%s1202_s18 + $0x8] sm:$0xff] %v579_v39 }
 0x26f   : > { %v581_v40 = vpop.f32.mrf.mxu3 }
 0x270   : > { %v582_v41 = vadd.f32 %v841_v35, %v581_v40 }
 0x272   : > { %625 = vst [vmem:[%s1202_s18 + $0x10] sm:$0xff] %v582_v41 }
 0x277   : > { %v584_v42 = vpop.f32.mrf.mxu3 }
 0x278   : > { %v585_v43 = vadd.f32 %v841_v35, %v584_v42 }
 0x27a   : > { %626 = vst [vmem:[%s1202_s18 + $0x18] sm:$0xff] %v585_v43 }
 0x27f   : > { %v587_v44 = vpop.f32.mrf.mxu3 }
 0x280   : > { %v588_v45 = vadd.f32 %v841_v35, %v587_v44 }
 0x282   : > { %627 = vst [vmem:[%s1202_s18 + $0x20] sm:$0xff] %v588_v45 }
 0x287   : > { %v590_v46 = vpop.f32.mrf.mxu3 }
 0x288   : > { %v591_v47 = vadd.f32 %v841_v35, %v590_v46 }
 0x28a   : > { %628 = vst [vmem:[%s1202_s18 + $0x28] sm:$0xff] %v591_v47 }
 0x28f   : > { %v593_v49 = vpop.f32.mrf.mxu3 }
 0x290   : > { %v594_v51 = vadd.f32 %v841_v35, %v593_v49 }
 0x292   : > { %629 = vst [vmem:[%s1202_s18 + $0x30] sm:$0xff] %v594_v51 }
 0x297   : > { %v596_v52 = vpop.f32.mrf.mxu3 }
 0x298   : > { %v597_v53 = vadd.f32 %v841_v35, %v596_v52 }
 0x29a   : > { %630 = vst [vmem:[%s1202_s18 + $0x38] sm:$0xff] %v597_v53 }
 0x29f   : > { %v599_v54 = vpop.f32.mrf.mxu3 }
 0x2a0   : > { %v600_v55 = vadd.f32 %v841_v35, %v599_v54 }
 0x2a2   : > { %631 = vst [vmem:[%s1202_s18 + $0x40] sm:$0xff] %v600_v55 }
 0x2a7   : > { %v602_v56 = vpop.f32.mrf.mxu3 }
 0x2a8   : > { %v603_v57 = vadd.f32 %v841_v35, %v602_v56 }
 0x2aa   : > { %632 = vst [vmem:[%s1202_s18 + $0x48] sm:$0xff] %v603_v57 }
 0x2af   : > { %v605_v58 = vpop.f32.mrf.mxu3 }
 0x2b0   : > { %v606_v59 = vadd.f32 %v841_v35, %v605_v58 }
 0x2b2   : > { %633 = vst [vmem:[%s1202_s18 + $0x50] sm:$0xff] %v606_v59 }
 0x2b7   : > { %v608_v48 = vpop.f32.mrf.mxu3 }
 0x2b8   : > { %v609_v60 = vadd.f32 %v841_v35, %v608_v48 }
 0x2ba   : > { %634 = vst [vmem:[%s1202_s18 + $0x58] sm:$0xff] %v609_v60 }
 0x2bf   : > { %v611_v61 = vpop.f32.mrf.mxu3 }
 0x2c0   : > { %v612_v62 = vadd.f32 %v841_v35, %v611_v61 }
 0x2c2   : > { %635 = vst [vmem:[%s1202_s18 + $0x60] sm:$0xff] %v612_v62 }
 0x2c7   : > { %v614_v63 = vpop.f32.mrf.mxu3 }
 0x2c8   : > { %v615_v50 = vadd.f32 %v841_v35, %v614_v63 }
 0x2ca   : > { %636 = vst [vmem:[%s1202_s18 + $0x68] sm:$0xff] %v615_v50 }
 0x2cf   : > { %v617_v0 = vpop.f32.mrf.mxu3 }
 0x2d0   : > { %v618_v1 = vadd.f32 %v841_v35, %v617_v0 }
 0x2d2   : > { %637 = vst [vmem:[%s1202_s18 + $0x70] sm:$0xff] %v618_v1 }
 0x2d7   : > { %v620_v2 = vpop.f32.mrf.mxu3 }
 0x2d8   : > { %v621_v3 = vadd.f32 %v841_v35, %v620_v2 }
 0x2da   : > { %638 = vst [vmem:[%s1202_s18 + $0x78] sm:$0xff] %v621_v3 }
 0x2db   : > { %959 = shalt.err (!%p956_p10)
}
 0x2dc   : > { %s1008_s11 = smov 128   ;;  %s1009_s24 = smov 8  }
 0x2dd   : > { %777 = dma.vmem_to_hbm [thread:$0]  (%p1099_p3), %s653_s27, 2048, %s655_s28, %s640_s4, %s1008_s11, %s1008_s11, %s1009_s24  }
 0x2de PF: > { %s669_s25 = sand.u32 1, %s990_s12   ;;  %p1263_p12 = scmp.ge.s32.totalorder %s1002_s15, 2 }
 0x2df   : > { %s670_s5 = scalar_lea.sflag [#allocation4], %s669_s25 }
 0x2e0   : > { %p791_p13 = pnand %p1263_p12, %p1065_p6 }
 0x2e2   : > { %p792_p0 = pneg %p791_p13 }
 0x2e4   : > { %985 = dma.done.wait (%p792_p0), %s670_s5, 2048  }
 0x2e5   : > { %987 = vsyncadd (%p792_p0), %s670_s5, 4294965248  ;;  %p17_p5 = scmp.ge.s32.totalorder %s1089_s6, 4   ;;  %s1264_s12 = smov %s994_s13 }
 0x2e6   : > { %s1265_s13 = smov %s998_s14  ;;  %s1266_s14 = smov %s1105_s10 }
 0x2e7   : > { %s1267_s15 = smov %s1089_s6  ;;  %19 = sbr.rel (!%p17_p5) target bundleno = 6 (0x6), region = 88 }
 0x2ec   :  { %676 = vsyncpa [#allocation3], 1 }
 0x2ed   :  { %678 = vsyncpa [#allocation3 + $0x1], 1 }
 0x2ee   :  { %679 = vsyncpa [#allocation6], 1 }
 0x2ef   :  { %680 = vsyncpa [#allocation4], 1 }
 0x2f0   :  { %682 = vsyncpa [#allocation4 + $0x1], 1 }

</bundles_post_ra>
